<compile_context>
chip_gen: v7x
topology: tpu7x:2x2x1
jax: 0.10.0
libtpu: 0.0.40
codegen_flags: <defaults>
</compile_context>

<pallas_src>
import functools

import jax
import jax.numpy as jnp
import numpy as np
from jax import lax
from jax.experimental import pallas as pl
from jax.experimental.pallas import tpu as pltpu

D_MODEL = 32
N_HEAD = 4
SEQ = 8
BATCH = 2
EPS = 1e-5          # torch.nn.LayerNorm default eps


def _layernorm(x, gamma, beta):
    # CLIP's LayerNorm computes in fp32 and casts back; x is already fp32 here.
    # Two-pass (x - mu)^2 form: avoids E[x^2]-mu^2 cancellation at real scale.
    xf = x.astype(jnp.float32)
    mu = jnp.mean(xf, axis=-1, keepdims=True)
    xc = xf - mu
    var = jnp.mean(xc * xc, axis=-1, keepdims=True)
    inv = lax.rsqrt(var + EPS)
    return xc * inv * gamma + beta


def block_kernel(x_ref, ln1_g_ref, ln1_b_ref, w_qkv_ref, b_qkv_ref,
                 w_out_ref, b_out_ref, ln2_g_ref, ln2_b_ref,
                 w_fc_ref, b_fc_ref, w_proj_ref, b_proj_ref,
                 o_ref, *, n_batch, seq, n_head):
    D = x_ref.shape[-1]
    hd = D // n_head
    NL = n_batch * seq
    x = x_ref[...]                                          # (N*L, D) fp32

    # ------------- attention branch: x + out_proj(MHA(LN1(x))) -------------
    y = _layernorm(x, ln1_g_ref[...], ln1_b_ref[...])
    # Q-scale (1/sqrt(hd)) already folded into w_qkv / b_qkv by prepare_params.
    qkv = jnp.dot(y, w_qkv_ref[...],
                  preferred_element_type=jnp.float32) + b_qkv_ref[...]  # (N*L, 3D)

    # Free leading-dim split (tile-aligned): (N*L, 3D) -> (N, L, 3D).
    qkv3 = qkv.reshape(n_batch, seq, 3 * D)
    q = qkv3[:, :, :D]                                       # (N, L, D)
    k = qkv3[:, :, D:2 * D]
    v = qkv3[:, :, 2 * D:]

    # Per-head attention, batched over N; head-merge folded into accumulated
    # out-projection (no concatenates anywhere).
    attn_out = jnp.zeros((NL, D), jnp.float32)
    for h in range(n_head):                                  # n_head = 4
        sl = slice(h * hd, (h + 1) * hd)
        qh = q[:, :, sl]                                     # (N, L, hd)
        kh = k[:, :, sl]
        vh = v[:, :, sl]
        s = jnp.einsum('bqd,bkd->bqk', qh, kh,
                       preferred_element_type=jnp.float32)   # (N, L, L)
        s = s - jnp.max(s, axis=-1, keepdims=True)
        p = jnp.exp(s)
        denom = jnp.sum(p, axis=-1, keepdims=True)
        # Exact reciprocal (review correctness concern); approx=True is a free
        # EUP win at CLIP scale under a looser tolerance.
        p = p * pl.reciprocal(denom, approx=False)
        ah = jnp.einsum('bqk,bkd->bqd', p, vh,
                        preferred_element_type=jnp.float32)  # (N, L, hd)
        # Head-merge + out_proj: concat(a_h) @ W_out == sum_h a_h @ W_out_rows_h
        attn_out = attn_out + jnp.dot(
            ah.reshape(NL, hd),                              # free leading merge
            w_out_ref[h * hd:(h + 1) * hd, :],               # sublane-aligned slice
            preferred_element_type=jnp.float32)
    x = x + attn_out + b_out_ref[...]
    # TODO(synk): attn_mask support (None in this CLIP configuration).

    # ------------- MLP branch: x + c_proj(QuickGELU(c_fc(LN2(x)))) ----------
    y = _layernorm(x, ln2_g_ref[...], ln2_b_ref[...])
    h1 = jnp.dot(y, w_fc_ref[...],
                 preferred_element_type=jnp.float32) + b_fc_ref[...]        # (N*L, 4D)
    h1 = h1 * jax.nn.sigmoid(1.702 * h1)                                    # QuickGELU
    h2 = jnp.dot(h1, w_proj_ref[...],
                 preferred_element_type=jnp.float32) + b_proj_ref[...]      # (N*L, D)
    res = (x + h2).astype(o_ref.dtype)

    # Lane-dense store: pad last dim to the 128-wide output slab (unmasked vst).
    d_pad = o_ref.shape[-1]
    if d_pad > D:
        pad = jnp.zeros((NL, d_pad - D), dtype=o_ref.dtype)
        res = jnp.concatenate([res, pad], axis=-1)
    o_ref[...] = res


def prepare_params(params, n_head=N_HEAD):
    """One-time parameter prep (do NOT call per forward pass): transpose
    PyTorch (out,in) weights to (in,out) and fold the 1/sqrt(head_dim) scale
    into the Q slice of the in_proj weight/bias."""
    (ln1_g, ln1_b, in_proj_w, in_proj_b, out_proj_w, out_proj_b,
     ln2_g, ln2_b, c_fc_w, c_fc_b, c_proj_w, c_proj_b) = params
    D = ln1_g.shape[0]
    hd = D // n_head
    scale = 1.0 / float(np.sqrt(hd))

    w_qkv = in_proj_w.T                                          # (D, 3D)
    w_qkv = jnp.concatenate([w_qkv[:, :D] * scale, w_qkv[:, D:]], axis=1)
    b_qkv = jnp.concatenate([in_proj_b[:D] * scale, in_proj_b[D:]], axis=0)

    return dict(
        ln1_g=ln1_g.reshape(1, D), ln1_b=ln1_b.reshape(1, D),
        w_qkv=w_qkv, b_qkv=b_qkv.reshape(1, 3 * D),
        w_out=out_proj_w.T, b_out=out_proj_b.reshape(1, D),
        ln2_g=ln2_g.reshape(1, D), ln2_b=ln2_b.reshape(1, D),
        w_fc=c_fc_w.T, b_fc=c_fc_b.reshape(1, 4 * D),
        w_proj=c_proj_w.T, b_proj=c_proj_b.reshape(1, D),
    )


@jax.jit
def residual_attention_block(x_lnd, prep):
    """x_lnd: (L, N, D), PyTorch nn.MultiheadAttention layout. prep: output of
    prepare_params()."""
    L, N, D = x_lnd.shape
    H = N_HEAD
    d_pad = 128 * pl.cdiv(D, 128)                               # lane-dense output

    x2d = jnp.transpose(x_lnd, (1, 0, 2)).reshape(N * L, D)     # (N*L, D)

    kern = functools.partial(block_kernel, n_batch=N, seq=L, n_head=H)
    out2d = pl.pallas_call(
        kern,
        out_shape=jax.ShapeDtypeStruct((N * L, d_pad), x_lnd.dtype),
        # No grid at this toy size: one invocation, all operands VMEM-resident.
        # TODO(synk): at CLIP scale add a row-tile grid ("parallel" for v7x's
        # two TensorCores) with grid-invariant weight BlockSpecs.
        compiler_params=pltpu.CompilerParams(
            vmem_limit_bytes=32 * 1024 * 1024),
    )(x2d,
      prep['ln1_g'], prep['ln1_b'],
      prep['w_qkv'], prep['b_qkv'],
      prep['w_out'], prep['b_out'],
      prep['ln2_g'], prep['ln2_b'],
      prep['w_fc'], prep['b_fc'],
      prep['w_proj'], prep['b_proj'])

    out2d = out2d[:, :D]                                        # drop lane padding
    return jnp.transpose(out2d.reshape(N, L, D), (1, 0, 2))


# --------------------------- pure-JAX reference -----------------------------
def ref_block(x_lnd, params):
    (ln1_g, ln1_b, in_proj_w, in_proj_b, out_proj_w, out_proj_b,
     ln2_g, ln2_b, c_fc_w, c_fc_b, c_proj_w, c_proj_b) = params
    L, N, D = x_lnd.shape
    H, hd = N_HEAD, D // N_HEAD
    x = jnp.transpose(x_lnd, (1, 0, 2))                      # (N, L, D)

    def ln(v, g, b):
        mu = jnp.mean(v, -1, keepdims=True)
        var = jnp.mean((v - mu) ** 2, -1, keepdims=True)
        return (v - mu) * lax.rsqrt(var + EPS) * g + b

    y = ln(x, ln1_g, ln1_b)
    qkv = y @ in_proj_w.T + in_proj_b
    q, k, v = qkv[..., :D], qkv[..., D:2 * D], qkv[..., 2 * D:]
    q = q.reshape(N, L, H, hd).transpose(0, 2, 1, 3) / np.sqrt(hd)
    k = k.reshape(N, L, H, hd).transpose(0, 2, 1, 3)
    v = v.reshape(N, L, H, hd).transpose(0, 2, 1, 3)
    s = jnp.einsum("nhqd,nhkd->nhqk", q, k)
    p = jax.nn.softmax(s, axis=-1)
    a = jnp.einsum("nhqk,nhkd->nhqd", p, v).transpose(0, 2, 1, 3).reshape(N, L, D)
    x = x + (a @ out_proj_w.T + out_proj_b)

    y = ln(x, ln2_g, ln2_b)
    h1 = y @ c_fc_w.T + c_fc_b
    h1 = h1 * jax.nn.sigmoid(1.702 * h1)
    x = x + (h1 @ c_proj_w.T + c_proj_b)
    return jnp.transpose(x, (1, 0, 2))


if __name__ == "__main__":
    D = D_MODEL
    key = jax.random.PRNGKey(0)
    ks = jax.random.split(key, 13)

    def rnd(k, shape, scale=0.05):
        return (scale * jax.random.normal(k, shape)).astype(jnp.float32)

    # Raw PyTorch-convention parameters (shapes from nn.MultiheadAttention /
    # nn.Linear / nn.LayerNorm in the module's __init__).
    params = (
        1.0 + rnd(ks[8], (D,)), rnd(ks[9], (D,)),            # ln_1 (gamma, beta)
        rnd(ks[0], (3 * D, D)), rnd(ks[1], (3 * D,)),        # attn.in_proj (W, b)
        rnd(ks[2], (D, D)), rnd(ks[3], (D,)),                # attn.out_proj (W, b)
        1.0 + rnd(ks[10], (D,)), rnd(ks[11], (D,)),          # ln_2 (gamma, beta)
        rnd(ks[4], (4 * D, D)), rnd(ks[5], (4 * D,)),        # mlp.c_fc (W, b)
        rnd(ks[6], (D, 4 * D)), rnd(ks[7], (D,)),            # mlp.c_proj (W, b)
    )

    # attn_mask is None in this instantiation.
    x = jax.random.normal(ks[12], (SEQ, BATCH, D), jnp.float32)

    prep = jax.tree_util.tree_map(jax.block_until_ready,
                                  prepare_params(params))     # one-time prep

    out = jax.block_until_ready(residual_attention_block(x, prep))
    ref = jax.block_until_ready(ref_block(x, params))
    np.testing.assert_allclose(np.asarray(out), np.asarray(ref),
                               rtol=2e-3, atol=2e-3)
    print("KERNEL_OK")
</pallas_src>

<mosaic_0001>
module attributes {stable_mosaic.version = 11 : i64} {
  func.func @block_kernel(%arg0: memref<16x32xf32, #tpu.memory_space<vmem>>, %arg1: memref<1x32xf32, #tpu.memory_space<vmem>>, %arg2: memref<1x32xf32, #tpu.memory_space<vmem>>, %arg3: memref<32x96xf32, #tpu.memory_space<vmem>>, %arg4: memref<1x96xf32, #tpu.memory_space<vmem>>, %arg5: memref<32x32xf32, #tpu.memory_space<vmem>>, %arg6: memref<1x32xf32, #tpu.memory_space<vmem>>, %arg7: memref<1x32xf32, #tpu.memory_space<vmem>>, %arg8: memref<1x32xf32, #tpu.memory_space<vmem>>, %arg9: memref<32x128xf32, #tpu.memory_space<vmem>>, %arg10: memref<1x128xf32, #tpu.memory_space<vmem>>, %arg11: memref<128x32xf32, #tpu.memory_space<vmem>>, %arg12: memref<1x32xf32, #tpu.memory_space<vmem>>, %arg13: memref<16x128xf32, #tpu.memory_space<vmem>>) attributes {dimension_semantics = [], scalar_prefetch = 0 : i64, scratch_operands = 0 : i64, tpu.core_type = #tpu.core_type<tc>} {
    %c0 = arith.constant 0 : index
    %c0_0 = arith.constant 0 : index
    %0 = vector.load %arg0[%c0, %c0_0] : memref<16x32xf32, #tpu.memory_space<vmem>>, vector<16x32xf32>
    %c0_1 = arith.constant 0 : index
    %c0_2 = arith.constant 0 : index
    %1 = vector.load %arg1[%c0_1, %c0_2] : memref<1x32xf32, #tpu.memory_space<vmem>>, vector<1x32xf32>
    %c0_3 = arith.constant 0 : index
    %c0_4 = arith.constant 0 : index
    %2 = vector.load %arg2[%c0_3, %c0_4] : memref<1x32xf32, #tpu.memory_space<vmem>>, vector<1x32xf32>
    %cst = arith.constant dense<0.000000e+00> : vector<16xf32>
    %3 = vector.multi_reduction <add>, %0, %cst [1] : vector<16x32xf32> to vector<16xf32>
    %4 = vector.shape_cast %3 : vector<16xf32> to vector<16x1xf32>
    %cst_5 = arith.constant 3.200000e+01 : f32
    %5 = vector.broadcast %cst_5 : f32 to vector<16x1xf32>
    %6 = arith.divf %4, %5 : vector<16x1xf32>
    %7 = vector.broadcast %6 : vector<16x1xf32> to vector<16x32xf32>
    %8 = arith.subf %0, %7 : vector<16x32xf32>
    %9 = arith.mulf %8, %8 : vector<16x32xf32>
    %cst_6 = arith.constant dense<0.000000e+00> : vector<16xf32>
    %10 = vector.multi_reduction <add>, %9, %cst_6 [1] : vector<16x32xf32> to vector<16xf32>
    %11 = vector.shape_cast %10 : vector<16xf32> to vector<16x1xf32>
    %cst_7 = arith.constant 3.200000e+01 : f32
    %12 = vector.broadcast %cst_7 : f32 to vector<16x1xf32>
    %13 = arith.divf %11, %12 : vector<16x1xf32>
    %cst_8 = arith.constant 9.99999974E-6 : f32
    %14 = vector.broadcast %cst_8 : f32 to vector<16x1xf32>
    %15 = arith.addf %13, %14 : vector<16x1xf32>
    %16 = math.rsqrt %15 : vector<16x1xf32>
    %17 = vector.broadcast %16 : vector<16x1xf32> to vector<16x32xf32>
    %18 = arith.mulf %8, %17 : vector<16x32xf32>
    %19 = vector.broadcast %1 : vector<1x32xf32> to vector<16x32xf32>
    %20 = arith.mulf %18, %19 : vector<16x32xf32>
    %21 = vector.broadcast %2 : vector<1x32xf32> to vector<16x32xf32>
    %22 = arith.addf %20, %21 : vector<16x32xf32>
    %c0_9 = arith.constant 0 : index
    %c0_10 = arith.constant 0 : index
    %23 = vector.load %arg3[%c0_9, %c0_10] : memref<32x96xf32, #tpu.memory_space<vmem>>, vector<32x96xf32>
    %cst_11 = arith.constant dense<0.000000e+00> : vector<16x96xf32>
    %24 = tpu.matmul %22, %23, %cst_11 {dimension_numbers = #tpu.dot_dimension_numbers<[1], [0], [0], [1], [0, 0, 1, 1], [], []>} : vector<16x32xf32>, vector<32x96xf32>, vector<16x96xf32> -> vector<16x96xf32>
    %c0_12 = arith.constant 0 : index
    %c0_13 = arith.constant 0 : index
    %25 = vector.load %arg4[%c0_12, %c0_13] : memref<1x96xf32, #tpu.memory_space<vmem>>, vector<1x96xf32>
    %26 = vector.broadcast %25 : vector<1x96xf32> to vector<16x96xf32>
    %27 = arith.addf %24, %26 : vector<16x96xf32>
    %28 = vector.shape_cast %27 : vector<16x96xf32> to vector<2x8x96xf32>
    %29 = vector.extract_strided_slice %28 {offsets = [0, 0, 0], sizes = [2, 8, 32], strides = [1, 1, 1]} : vector<2x8x96xf32> to vector<2x8x32xf32>
    %30 = vector.extract_strided_slice %28 {offsets = [0, 0, 32], sizes = [2, 8, 32], strides = [1, 1, 1]} : vector<2x8x96xf32> to vector<2x8x32xf32>
    %31 = vector.extract_strided_slice %28 {offsets = [0, 0, 64], sizes = [2, 8, 32], strides = [1, 1, 1]} : vector<2x8x96xf32> to vector<2x8x32xf32>
    %cst_14 = arith.constant 0.000000e+00 : f32
    %32 = vector.broadcast %cst_14 : f32 to vector<16x32xf32>
    %33 = vector.extract_strided_slice %29 {offsets = [0, 0, 0], sizes = [2, 8, 8], strides = [1, 1, 1]} : vector<2x8x32xf32> to vector<2x8x8xf32>
    %34 = vector.extract_strided_slice %30 {offsets = [0, 0, 0], sizes = [2, 8, 8], strides = [1, 1, 1]} : vector<2x8x32xf32> to vector<2x8x8xf32>
    %35 = vector.extract_strided_slice %31 {offsets = [0, 0, 0], sizes = [2, 8, 8], strides = [1, 1, 1]} : vector<2x8x32xf32> to vector<2x8x8xf32>
    "tpu.trace_start"() <{level = 10 : i32, message = "bqd,bkd->bqk"}> : () -> ()
    %cst_15 = arith.constant dense<0.000000e+00> : vector<2x8x8xf32>
    %36 = tpu.matmul %33, %34, %cst_15 {dimension_numbers = #tpu.dot_dimension_numbers<[2], [2], [1], [1], [0, 0, 0, 1, 1, 1], [0], [0]>} : vector<2x8x8xf32>, vector<2x8x8xf32>, vector<2x8x8xf32> -> vector<2x8x8xf32>
    "tpu.trace_stop"() : () -> ()
    %cst_16 = arith.constant dense<0xFF800000> : vector<2x8xf32>
    %37 = vector.multi_reduction <maximumf>, %36, %cst_16 [2] : vector<2x8x8xf32> to vector<2x8xf32>
    %38 = vector.shape_cast %37 : vector<2x8xf32> to vector<2x8x1xf32>
    %39 = vector.broadcast %38 : vector<2x8x1xf32> to vector<2x8x8xf32>
    %40 = arith.subf %36, %39 : vector<2x8x8xf32>
    %41 = math.exp %40 : vector<2x8x8xf32>
    %cst_17 = arith.constant dense<0.000000e+00> : vector<2x8xf32>
    %42 = vector.multi_reduction <add>, %41, %cst_17 [2] : vector<2x8x8xf32> to vector<2x8xf32>
    %43 = vector.shape_cast %42 : vector<2x8xf32> to vector<2x8x1xf32>
    %44 = tpu.reciprocal %43 : vector<2x8x1xf32> -> vector<2x8x1xf32>
    %45 = vector.broadcast %44 : vector<2x8x1xf32> to vector<2x8x8xf32>
    %46 = arith.mulf %41, %45 : vector<2x8x8xf32>
    "tpu.trace_start"() <{level = 10 : i32, message = "bqk,bkd->bqd"}> : () -> ()
    %cst_18 = arith.constant dense<0.000000e+00> : vector<2x8x8xf32>
    %47 = tpu.matmul %46, %35, %cst_18 {dimension_numbers = #tpu.dot_dimension_numbers<[2], [1], [1], [2], [0, 0, 0, 1, 1, 2], [0], [0]>} : vector<2x8x8xf32>, vector<2x8x8xf32>, vector<2x8x8xf32> -> vector<2x8x8xf32>
    "tpu.trace_stop"() : () -> ()
    %48 = vector.shape_cast %47 : vector<2x8x8xf32> to vector<16x8xf32>
    %c0_19 = arith.constant 0 : index
    %c0_20 = arith.constant 0 : index
    %49 = vector.load %arg5[%c0_19, %c0_20] : memref<32x32xf32, #tpu.memory_space<vmem>>, vector<8x32xf32>
    %cst_21 = arith.constant dense<0.000000e+00> : vector<16x32xf32>
    %50 = tpu.matmul %48, %49, %cst_21 {dimension_numbers = #tpu.dot_dimension_numbers<[1], [0], [0], [1], [0, 0, 1, 1], [], []>} : vector<16x8xf32>, vector<8x32xf32>, vector<16x32xf32> -> vector<16x32xf32>
    %51 = arith.addf %32, %50 : vector<16x32xf32>
    %52 = vector.extract_strided_slice %29 {offsets = [0, 0, 8], sizes = [2, 8, 8], strides = [1, 1, 1]} : vector<2x8x32xf32> to vector<2x8x8xf32>
    %53 = vector.extract_strided_slice %30 {offsets = [0, 0, 8], sizes = [2, 8, 8], strides = [1, 1, 1]} : vector<2x8x32xf32> to vector<2x8x8xf32>
    %54 = vector.extract_strided_slice %31 {offsets = [0, 0, 8], sizes = [2, 8, 8], strides = [1, 1, 1]} : vector<2x8x32xf32> to vector<2x8x8xf32>
    "tpu.trace_start"() <{level = 10 : i32, message = "bqd,bkd->bqk"}> : () -> ()
    %cst_22 = arith.constant dense<0.000000e+00> : vector<2x8x8xf32>
    %55 = tpu.matmul %52, %53, %cst_22 {dimension_numbers = #tpu.dot_dimension_numbers<[2], [2], [1], [1], [0, 0, 0, 1, 1, 1], [0], [0]>} : vector<2x8x8xf32>, vector<2x8x8xf32>, vector<2x8x8xf32> -> vector<2x8x8xf32>
    "tpu.trace_stop"() : () -> ()
    %cst_23 = arith.constant dense<0xFF800000> : vector<2x8xf32>
    %56 = vector.multi_reduction <maximumf>, %55, %cst_23 [2] : vector<2x8x8xf32> to vector<2x8xf32>
    %57 = vector.shape_cast %56 : vector<2x8xf32> to vector<2x8x1xf32>
    %58 = vector.broadcast %57 : vector<2x8x1xf32> to vector<2x8x8xf32>
    %59 = arith.subf %55, %58 : vector<2x8x8xf32>
    %60 = math.exp %59 : vector<2x8x8xf32>
    %cst_24 = arith.constant dense<0.000000e+00> : vector<2x8xf32>
    %61 = vector.multi_reduction <add>, %60, %cst_24 [2] : vector<2x8x8xf32> to vector<2x8xf32>
    %62 = vector.shape_cast %61 : vector<2x8xf32> to vector<2x8x1xf32>
    %63 = tpu.reciprocal %62 : vector<2x8x1xf32> -> vector<2x8x1xf32>
    %64 = vector.broadcast %63 : vector<2x8x1xf32> to vector<2x8x8xf32>
    %65 = arith.mulf %60, %64 : vector<2x8x8xf32>
    "tpu.trace_start"() <{level = 10 : i32, message = "bqk,bkd->bqd"}> : () -> ()
    %cst_25 = arith.constant dense<0.000000e+00> : vector<2x8x8xf32>
    %66 = tpu.matmul %65, %54, %cst_25 {dimension_numbers = #tpu.dot_dimension_numbers<[2], [1], [1], [2], [0, 0, 0, 1, 1, 2], [0], [0]>} : vector<2x8x8xf32>, vector<2x8x8xf32>, vector<2x8x8xf32> -> vector<2x8x8xf32>
    "tpu.trace_stop"() : () -> ()
    %67 = vector.shape_cast %66 : vector<2x8x8xf32> to vector<16x8xf32>
    %c8 = arith.constant 8 : index
    %c0_26 = arith.constant 0 : index
    %68 = vector.load %arg5[%c8, %c0_26] : memref<32x32xf32, #tpu.memory_space<vmem>>, vector<8x32xf32>
    %cst_27 = arith.constant dense<0.000000e+00> : vector<16x32xf32>
    %69 = tpu.matmul %67, %68, %cst_27 {dimension_numbers = #tpu.dot_dimension_numbers<[1], [0], [0], [1], [0, 0, 1, 1], [], []>} : vector<16x8xf32>, vector<8x32xf32>, vector<16x32xf32> -> vector<16x32xf32>
    %70 = arith.addf %51, %69 : vector<16x32xf32>
    %71 = vector.extract_strided_slice %29 {offsets = [0, 0, 16], sizes = [2, 8, 8], strides = [1, 1, 1]} : vector<2x8x32xf32> to vector<2x8x8xf32>
    %72 = vector.extract_strided_slice %30 {offsets = [0, 0, 16], sizes = [2, 8, 8], strides = [1, 1, 1]} : vector<2x8x32xf32> to vector<2x8x8xf32>
    %73 = vector.extract_strided_slice %31 {offsets = [0, 0, 16], sizes = [2, 8, 8], strides = [1, 1, 1]} : vector<2x8x32xf32> to vector<2x8x8xf32>
    "tpu.trace_start"() <{level = 10 : i32, message = "bqd,bkd->bqk"}> : () -> ()
    %cst_28 = arith.constant dense<0.000000e+00> : vector<2x8x8xf32>
    %74 = tpu.matmul %71, %72, %cst_28 {dimension_numbers = #tpu.dot_dimension_numbers<[2], [2], [1], [1], [0, 0, 0, 1, 1, 1], [0], [0]>} : vector<2x8x8xf32>, vector<2x8x8xf32>, vector<2x8x8xf32> -> vector<2x8x8xf32>
    "tpu.trace_stop"() : () -> ()
    %cst_29 = arith.constant dense<0xFF800000> : vector<2x8xf32>
    %75 = vector.multi_reduction <maximumf>, %74, %cst_29 [2] : vector<2x8x8xf32> to vector<2x8xf32>
    %76 = vector.shape_cast %75 : vector<2x8xf32> to vector<2x8x1xf32>
    %77 = vector.broadcast %76 : vector<2x8x1xf32> to vector<2x8x8xf32>
    %78 = arith.subf %74, %77 : vector<2x8x8xf32>
    %79 = math.exp %78 : vector<2x8x8xf32>
    %cst_30 = arith.constant dense<0.000000e+00> : vector<2x8xf32>
    %80 = vector.multi_reduction <add>, %79, %cst_30 [2] : vector<2x8x8xf32> to vector<2x8xf32>
    %81 = vector.shape_cast %80 : vector<2x8xf32> to vector<2x8x1xf32>
    %82 = tpu.reciprocal %81 : vector<2x8x1xf32> -> vector<2x8x1xf32>
    %83 = vector.broadcast %82 : vector<2x8x1xf32> to vector<2x8x8xf32>
    %84 = arith.mulf %79, %83 : vector<2x8x8xf32>
    "tpu.trace_start"() <{level = 10 : i32, message = "bqk,bkd->bqd"}> : () -> ()
    %cst_31 = arith.constant dense<0.000000e+00> : vector<2x8x8xf32>
    %85 = tpu.matmul %84, %73, %cst_31 {dimension_numbers = #tpu.dot_dimension_numbers<[2], [1], [1], [2], [0, 0, 0, 1, 1, 2], [0], [0]>} : vector<2x8x8xf32>, vector<2x8x8xf32>, vector<2x8x8xf32> -> vector<2x8x8xf32>
    "tpu.trace_stop"() : () -> ()
    %86 = vector.shape_cast %85 : vector<2x8x8xf32> to vector<16x8xf32>
    %c16 = arith.constant 16 : index
    %c0_32 = arith.constant 0 : index
    %87 = vector.load %arg5[%c16, %c0_32] : memref<32x32xf32, #tpu.memory_space<vmem>>, vector<8x32xf32>
    %cst_33 = arith.constant dense<0.000000e+00> : vector<16x32xf32>
    %88 = tpu.matmul %86, %87, %cst_33 {dimension_numbers = #tpu.dot_dimension_numbers<[1], [0], [0], [1], [0, 0, 1, 1], [], []>} : vector<16x8xf32>, vector<8x32xf32>, vector<16x32xf32> -> vector<16x32xf32>
    %89 = arith.addf %70, %88 : vector<16x32xf32>
    %90 = vector.extract_strided_slice %29 {offsets = [0, 0, 24], sizes = [2, 8, 8], strides = [1, 1, 1]} : vector<2x8x32xf32> to vector<2x8x8xf32>
    %91 = vector.extract_strided_slice %30 {offsets = [0, 0, 24], sizes = [2, 8, 8], strides = [1, 1, 1]} : vector<2x8x32xf32> to vector<2x8x8xf32>
    %92 = vector.extract_strided_slice %31 {offsets = [0, 0, 24], sizes = [2, 8, 8], strides = [1, 1, 1]} : vector<2x8x32xf32> to vector<2x8x8xf32>
    "tpu.trace_start"() <{level = 10 : i32, message = "bqd,bkd->bqk"}> : () -> ()
    %cst_34 = arith.constant dense<0.000000e+00> : vector<2x8x8xf32>
    %93 = tpu.matmul %90, %91, %cst_34 {dimension_numbers = #tpu.dot_dimension_numbers<[2], [2], [1], [1], [0, 0, 0, 1, 1, 1], [0], [0]>} : vector<2x8x8xf32>, vector<2x8x8xf32>, vector<2x8x8xf32> -> vector<2x8x8xf32>
    "tpu.trace_stop"() : () -> ()
    %cst_35 = arith.constant dense<0xFF800000> : vector<2x8xf32>
    %94 = vector.multi_reduction <maximumf>, %93, %cst_35 [2] : vector<2x8x8xf32> to vector<2x8xf32>
    %95 = vector.shape_cast %94 : vector<2x8xf32> to vector<2x8x1xf32>
    %96 = vector.broadcast %95 : vector<2x8x1xf32> to vector<2x8x8xf32>
    %97 = arith.subf %93, %96 : vector<2x8x8xf32>
    %98 = math.exp %97 : vector<2x8x8xf32>
    %cst_36 = arith.constant dense<0.000000e+00> : vector<2x8xf32>
    %99 = vector.multi_reduction <add>, %98, %cst_36 [2] : vector<2x8x8xf32> to vector<2x8xf32>
    %100 = vector.shape_cast %99 : vector<2x8xf32> to vector<2x8x1xf32>
    %101 = tpu.reciprocal %100 : vector<2x8x1xf32> -> vector<2x8x1xf32>
    %102 = vector.broadcast %101 : vector<2x8x1xf32> to vector<2x8x8xf32>
    %103 = arith.mulf %98, %102 : vector<2x8x8xf32>
    "tpu.trace_start"() <{level = 10 : i32, message = "bqk,bkd->bqd"}> : () -> ()
    %cst_37 = arith.constant dense<0.000000e+00> : vector<2x8x8xf32>
    %104 = tpu.matmul %103, %92, %cst_37 {dimension_numbers = #tpu.dot_dimension_numbers<[2], [1], [1], [2], [0, 0, 0, 1, 1, 2], [0], [0]>} : vector<2x8x8xf32>, vector<2x8x8xf32>, vector<2x8x8xf32> -> vector<2x8x8xf32>
    "tpu.trace_stop"() : () -> ()
    %105 = vector.shape_cast %104 : vector<2x8x8xf32> to vector<16x8xf32>
    %c24 = arith.constant 24 : index
    %c0_38 = arith.constant 0 : index
    %106 = vector.load %arg5[%c24, %c0_38] : memref<32x32xf32, #tpu.memory_space<vmem>>, vector<8x32xf32>
    %cst_39 = arith.constant dense<0.000000e+00> : vector<16x32xf32>
    %107 = tpu.matmul %105, %106, %cst_39 {dimension_numbers = #tpu.dot_dimension_numbers<[1], [0], [0], [1], [0, 0, 1, 1], [], []>} : vector<16x8xf32>, vector<8x32xf32>, vector<16x32xf32> -> vector<16x32xf32>
    %108 = arith.addf %89, %107 : vector<16x32xf32>
    %109 = arith.addf %0, %108 : vector<16x32xf32>
    %c0_40 = arith.constant 0 : index
    %c0_41 = arith.constant 0 : index
    %110 = vector.load %arg6[%c0_40, %c0_41] : memref<1x32xf32, #tpu.memory_space<vmem>>, vector<1x32xf32>
    %111 = vector.broadcast %110 : vector<1x32xf32> to vector<16x32xf32>
    %112 = arith.addf %109, %111 : vector<16x32xf32>
    %c0_42 = arith.constant 0 : index
    %c0_43 = arith.constant 0 : index
    %113 = vector.load %arg7[%c0_42, %c0_43] : memref<1x32xf32, #tpu.memory_space<vmem>>, vector<1x32xf32>
    %c0_44 = arith.constant 0 : index
    %c0_45 = arith.constant 0 : index
    %114 = vector.load %arg8[%c0_44, %c0_45] : memref<1x32xf32, #tpu.memory_space<vmem>>, vector<1x32xf32>
    %cst_46 = arith.constant dense<0.000000e+00> : vector<16xf32>
    %115 = vector.multi_reduction <add>, %112, %cst_46 [1] : vector<16x32xf32> to vector<16xf32>
    %116 = vector.shape_cast %115 : vector<16xf32> to vector<16x1xf32>
    %cst_47 = arith.constant 3.200000e+01 : f32
    %117 = vector.broadcast %cst_47 : f32 to vector<16x1xf32>
    %118 = arith.divf %116, %117 : vector<16x1xf32>
    %119 = vector.broadcast %118 : vector<16x1xf32> to vector<16x32xf32>
    %120 = arith.subf %112, %119 : vector<16x32xf32>
    %121 = arith.mulf %120, %120 : vector<16x32xf32>
    %cst_48 = arith.constant dense<0.000000e+00> : vector<16xf32>
    %122 = vector.multi_reduction <add>, %121, %cst_48 [1] : vector<16x32xf32> to vector<16xf32>
    %123 = vector.shape_cast %122 : vector<16xf32> to vector<16x1xf32>
    %cst_49 = arith.constant 3.200000e+01 : f32
    %124 = vector.broadcast %cst_49 : f32 to vector<16x1xf32>
    %125 = arith.divf %123, %124 : vector<16x1xf32>
    %cst_50 = arith.constant 9.99999974E-6 : f32
    %126 = vector.broadcast %cst_50 : f32 to vector<16x1xf32>
    %127 = arith.addf %125, %126 : vector<16x1xf32>
    %128 = math.rsqrt %127 : vector<16x1xf32>
    %129 = vector.broadcast %128 : vector<16x1xf32> to vector<16x32xf32>
    %130 = arith.mulf %120, %129 : vector<16x32xf32>
    %131 = vector.broadcast %113 : vector<1x32xf32> to vector<16x32xf32>
    %132 = arith.mulf %130, %131 : vector<16x32xf32>
    %133 = vector.broadcast %114 : vector<1x32xf32> to vector<16x32xf32>
    %134 = arith.addf %132, %133 : vector<16x32xf32>
    %c0_51 = arith.constant 0 : index
    %c0_52 = arith.constant 0 : index
    %135 = vector.load %arg9[%c0_51, %c0_52] : memref<32x128xf32, #tpu.memory_space<vmem>>, vector<32x128xf32>
    %cst_53 = arith.constant dense<0.000000e+00> : vector<16x128xf32>
    %136 = tpu.matmul %134, %135, %cst_53 {dimension_numbers = #tpu.dot_dimension_numbers<[1], [0], [0], [1], [0, 0, 1, 1], [], []>} : vector<16x32xf32>, vector<32x128xf32>, vector<16x128xf32> -> vector<16x128xf32>
    %c0_54 = arith.constant 0 : index
    %c0_55 = arith.constant 0 : index
    %137 = vector.load %arg10[%c0_54, %c0_55] : memref<1x128xf32, #tpu.memory_space<vmem>>, vector<1x128xf32>
    %138 = vector.broadcast %137 : vector<1x128xf32> to vector<16x128xf32>
    %139 = arith.addf %136, %138 : vector<16x128xf32>
    %cst_56 = arith.constant 1.702000e+00 : f32
    %140 = vector.broadcast %cst_56 : f32 to vector<16x128xf32>
    %141 = arith.mulf %140, %139 : vector<16x128xf32>
    %142 = arith.negf %141 : vector<16x128xf32>
    %143 = math.exp %142 : vector<16x128xf32>
    %cst_57 = arith.constant 1.000000e+00 : f32
    %144 = vector.broadcast %cst_57 : f32 to vector<16x128xf32>
    %145 = arith.addf %144, %143 : vector<16x128xf32>
    %146 = arith.divf %144, %145 : vector<16x128xf32>
    %147 = arith.mulf %139, %146 : vector<16x128xf32>
    %c0_58 = arith.constant 0 : index
    %c0_59 = arith.constant 0 : index
    %148 = vector.load %arg11[%c0_58, %c0_59] : memref<128x32xf32, #tpu.memory_space<vmem>>, vector<128x32xf32>
    %cst_60 = arith.constant dense<0.000000e+00> : vector<16x32xf32>
    %149 = tpu.matmul %147, %148, %cst_60 {dimension_numbers = #tpu.dot_dimension_numbers<[1], [0], [0], [1], [0, 0, 1, 1], [], []>} : vector<16x128xf32>, vector<128x32xf32>, vector<16x32xf32> -> vector<16x32xf32>
    %c0_61 = arith.constant 0 : index
    %c0_62 = arith.constant 0 : index
    %150 = vector.load %arg12[%c0_61, %c0_62] : memref<1x32xf32, #tpu.memory_space<vmem>>, vector<1x32xf32>
    %151 = vector.broadcast %150 : vector<1x32xf32> to vector<16x32xf32>
    %152 = arith.addf %149, %151 : vector<16x32xf32>
    %153 = arith.addf %112, %152 : vector<16x32xf32>
    %cst_63 = arith.constant 0.000000e+00 : f32
    %154 = vector.broadcast %cst_63 : f32 to vector<16x96xf32>
    %155 = tpu.concatenate %153, %154 in 1 : vector<16x32xf32>, vector<16x96xf32> -> vector<16x128xf32>
    %c0_64 = arith.constant 0 : index
    %c0_65 = arith.constant 0 : index
    %156 = vector.load %arg13[%c0_64, %c0_65] : memref<16x128xf32, #tpu.memory_space<vmem>>, vector<16x128xf32>
    tpu.vector_store %arg13[%c0_64, %c0_65], %155 {strides = array<i32>} : memref<16x128xf32, #tpu.memory_space<vmem>>, vector<16x128xf32>,
    return
  }
}

</mosaic_0001>

<bundles_post_ra>
// kernel: residual_attention_block.1
= control target key start
LH: loop header
LB: loop body
LE: loop exit
PB: predicated region body
PF: predicated region fallthrough
CT: control target
= control target key end

     0   :  { %vm48_vm0 = vcmask 261120   ;;  %v2498_v36 = vmov 0.0   ;;  %vm2499_vm1 = vmmov 0   ;;  %s2500_s22 = smov 96   ;;  %vm187_vm2 = vcmask 64512   ;;  %s2502_s23 = smov 88   ;;  %s2873_s0 = inlined_call_operand.vmem [shape: f32[16,32], index: 0, kind: input, shape index: {}]   ;;  %s2874_s3 = inlined_call_operand.vmem [shape: f32[32,96], index: 3, kind: input, shape index: {}]   ;;  %s2875_s1 = inlined_call_operand.vmem [shape: f32[1,32], index: 1, kind: input, shape index: {}]   ;;  %s2876_s2 = inlined_call_operand.vmem [shape: f32[1,32], index: 2, kind: input, shape index: {}]   ;;  %s2877_s4 = inlined_call_operand.vmem [shape: f32[1,96], index: 4, kind: input, shape index: {}]   ;;  %s2878_s5 = inlined_call_operand.vmem [shape: f32[32,32], index: 5, kind: input, shape index: {}]   ;;  %s2879_s6 = inlined_call_operand.vmem [shape: f32[1,32], index: 6, kind: input, shape index: {}]   ;;  %s2880_s9 = inlined_call_operand.vmem [shape: f32[32,128], index: 9, kind: input, shape index: {}]   ;;  %s2881_s7 = inlined_call_operand.vmem [shape: f32[1,32], index: 7, kind: input, shape index: {}]   ;;  %s2882_s8 = inlined_call_operand.vmem [shape: f32[1,32], index: 8, kind: input, shape index: {}]   ;;  %s2883_s11 = inlined_call_operand.vmem [shape: f32[128,32], index: 11, kind: input, shape index: {}]   ;;  %s2884_s10 = inlined_call_operand.vmem [shape: f32[1,128], index: 10, kind: input, shape index: {}]   ;;  %s2885_s12 = inlined_call_operand.vmem [shape: f32[1,32], index: 12, kind: input, shape index: {}]   ;;  %s2886_s13 = inlined_call_operand.vmem [shape: f32[16,128], index: 13, kind: output, shape index: {}]  }
   0x1   :  { %v2584_v0 = vld [vmem:[%s2873_s0] sm:$0xff]  ;;  %v2589_v1 = vld [vmem:[%s2873_s0 + $0x8] sm:$0xff]  ;;  %v94_v16 = vld [vmem:[%s2874_s3 + $0x10] sm:$0xff]  ;;  %2267 = vmatprep.subr.mxu0 %v2498_v36  ;;  %2269 = vmatprep.mubr.msk.f32.mxu0 %vm2499_vm1, %v2498_v36  ;;  %s2503_s24 = smov 120   ;;  %s2504_s25 = smov 80  }
   0x2   :  { %v49_v2 = vsel %vm48_vm0, %v2584_v0, 0.0  ;;  %v52_v3 = vsel %vm48_vm0, %v2589_v1, 0.0  ;;  %v92_v14 = vld [vmem:[%s2874_s3] sm:$0xff]  ;;  %v93_v15 = vld [vmem:[%s2874_s3 + $0x8] sm:$0xff]  ;;  %v95_v18 = vld [vmem:[%s2874_s3 + $0x18] sm:$0xff]  ;;  %s2505_s26 = smov 56  }
   0x3   :  { %50 = vadd.xlane.f32.xlu0 %v49_v2  ;;  %v2383_v17 = vpack.c.bf16 %v93_v15, %v92_v14  ;;  %v2387_v19 = vpack.c.bf16 %v95_v18, %v94_v16  ;;  %v2106_v27 = vld [vmem:[%s2875_s1] ss:$0 sm:$0xff]  ;;  %s2506_s27 = smov 112   ;;  %s2507_s28 = smov 48  }
   0x4   :  { %v2107_v29 = vld [vmem:[%s2876_s2] ss:$0 sm:$0xff]  ;;  %s2508_s0 = smov 72   ;;  %s2509_s29 = smov 104  }
   0x5   :  { %2384 = vmatprep.subr.bf16.mxu1 %v2383_v17  ;;  %v2108_v37 = vld [vmem:[%s2877_s4] ss:$0 sm:$0xff]  ;;  %s2501_s4 = smov 64   ;;  %s2510_s19 = smov 40  }
   0x6   :  { %2386 = vmatpush3.bf16.msra.mxu1 %v2383_v17 }
   0x7   :  { %53 = vadd.xlane.f32.xlu0 %v52_v3  ;;  %2388 = vmatprep.subr.bf16.mxu1 %v2387_v19 }
   0xa   :  { %2390 = vmatpush3.bf16.msra.mxu1 %v2387_v19 }
   0xb   :  { %2237 = vmatprep.subr.mxu1 %v2498_v36 }
  0x90   :  { %v51_v4 = vpop.xlane.xlu0 %50 }
  0x91   :  { %v56_v5 = vmul.f32 0.03125, %v51_v4 }
  0x93   :  { %v58_v6 = vsub.f32 %v2584_v0, %v56_v5 }
  0x94   :  { %v54_v7 = vpop.xlane.xlu0 %53 }
  0x95   :  { %v57_v8 = vmul.f32 0.03125, %v54_v7  ;;  %v60_v9 = vmul.f32 %v58_v6, %v58_v6 }
  0x97   :  { %v59_v10 = vsub.f32 %v2589_v1, %v57_v8  ;;  %v62_v11 = vsel %vm48_vm0, %v60_v9, 0.0 }
  0x98   :  { %63 = vadd.xlane.f32.xlu1 %v62_v11 }
  0x99   :  { %v61_v12 = vmul.f32 %v59_v10, %v59_v10 }
  0x9b   :  { %v65_v13 = vsel %vm48_vm0, %v61_v12, 0.0 }
  0x9c   :  { %66 = vadd.xlane.f32.xlu1 %v65_v13 }
 0x125   :  { %v64_v20 = vpop.xlane.xlu1 %63 }
 0x126   :  { %v68_v21 = vmul.f32 0.03125, %v64_v20 }
 0x128   :  { %v70_v22 = vadd.f32 1e-05, %v68_v21 }
 0x129   :  { %v67_v23 = vpop.xlane.xlu1 %66 }
 0x12a   :  { %2450 = vrsqrt.f32 %v70_v22  ;;  %v69_v24 = vmul.f32 0.03125, %v67_v23 }
 0x12c   :  { %v71_v25 = vadd.f32 1e-05, %v69_v24 }
 0x12e   :  { %2452 = vrsqrt.f32 %v71_v25 }
 0x134   :  { %v2451_v26 = vpop.eup %2450 }
 0x135   :  { %v74_v28 = vmul.f32 %v2451_v26, %v58_v6 }
 0x137   :  { %v82_v30 = vmul.f32 %v2106_v27, %v74_v28 }
 0x138   :  { %v2453_v31 = vpop.eup %2452 }
 0x139   :  { %v75_v32 = vmul.f32 %v2453_v31, %v59_v10  ;;  %v90_v33 = vadd.f32 %v2107_v29, %v82_v30 }
 0x13b   :  { %v83_v34 = vmul.f32 %v2106_v27, %v75_v32  ;;  %2234 = vmatprep.mubr.msk.f32.mxu1 %vm48_vm0, %v90_v33 }
 0x13d   :  { %v91_v35 = vadd.f32 %v2107_v29, %v83_v34 }
 0x13f   :  { %2235 = vmatmul.mubr.msk.f32.vlgmr.msra.gmra.mrb[0].mxu1 %vm48_vm0, %v91_v35 }
 0x140   :  { %2239 = vmatprep.mubr.msk.f32.mxu1 %vm2499_vm1, %v2498_v36 }
 0x212   :  { %v2236_v38 = vpop.f32.mrb[0].mxu1 }
 0x213   :  { %v2628_v39 = vadd.f32 %v2236_v38, %v2108_v37  ;;  %v175_v40 = vpop.f32.mrb[1].mxu1 }
 0x214   :  { %v2630_v41 = vadd.f32 %v2108_v37, %v175_v40 }
 0x215   :  { %263 = vrot.lane.b32.xlu1 %v2628_v39, %s2500_s22 }
 0x216   :  { %185 = vrot.lane.b32.xlu0 %v2630_v41, %s2500_s22 }
 0x287   :  { %v264_v43 = vpop.permute.xlu1 %263 }
 0x288   :  { %v186_v42 = vpop.permute.xlu0 %185 }
 0x289   :  { %2238 = vmatpush3.xpose.msk.msra.mxu1 %vm187_vm2, %v186_v42 }
 0x28a   :  { %2242 = vmatprep.subr.mxu1 %v2498_v36 }
 0x28c   :  { %2240 = vmatmul.mubr.msk.f32.vlgmr.msra.gmra.mrb[2].mxu1 %vm187_vm2, %v2630_v41 }
 0x28d   :  { %2243 = vmatpush3.xpose.msk.msra.mxu1 %vm187_vm2, %v264_v43  ;;  %2244 = vmatprep.mubr.msk.f32.mxu1 %vm2499_vm1, %v2498_v36 }
 0x28e   :  { %2247 = vmatprep.subr.mxu1 %v2498_v36 }
 0x290   :  { %2245 = vmatmul.mubr.msk.f32.vlgmr.msra.gmra.mrb[4].mxu1 %vm187_vm2, %v2628_v39 }
 0x291   :  { %2249 = vmatprep.mubr.msk.f32.mxu1 %vm2499_vm1, %v2498_v36 }
 0x35f   :  { %v258_v44 = vpop.f32.mrb[2].mxu1 }
 0x360   :  { %v2241_v45 = vpop.f32.mrb[3].mxu1  ;;  %v339_v46 = vsel %vm187_vm2, %v258_v44, -inf }
 0x361   :  { %340 = vmax.xlane.f32.xlu1 %v339_v46 }
 0x363   :  { %v335_v47 = vpop.f32.mrb[4].mxu1 }
 0x364   :  { %v2246_v48 = vpop.f32.mrb[5].mxu1  ;;  %v342_v49 = vsel %vm187_vm2, %v335_v47, -inf }
 0x365   :  { %343 = vmax.xlane.f32.xlu0 %v342_v49 }
 0x372   :  { %437 = vrot.lane.b32.xlu1 %v2628_v39, %s2501_s4 }
 0x376   :  { %516 = vrot.lane.b32.xlu1 %v2630_v41, %s2502_s23 }
 0x37a   :  { %514 = vrot.lane.b32.xlu1 %v2630_v41, %s2503_s24 }
 0x3ee   :  { %v341_v50 = vpop.xlane.xlu1 %340 }
 0x3ef   :  { %v345_v51 = vsub.f32 %v258_v44, %v341_v50 }
 0x3f1   :  { %v347_v52 = vmul.f32 1.442695, %v345_v51 }
 0x3f2   :  { %v344_v53 = vpop.xlane.xlu0 %343  ;;  %v438_v60 = vpop.permute.xlu1 %437 }
 0x3f3   :  { %2454 = vpow2.f32 %v347_v52  ;;  %v346_v54 = vsub.f32 %v335_v47, %v344_v53 }
 0x3f5   :  { %v349_v55 = vmul.f32 1.442695, %v346_v54  ;;  %v844_v54 = vld [vmem:[%s2878_s5 + $0x8] sm:$0xff] }
 0x3f6   :  { %v517_v61 = vpop.permute.xlu1 %516 }
 0x3f7   :  { %2456 = vpow2.f32 %v349_v55  ;;  %v513_v55 = vld [vmem:[%s2878_s5] sm:$0xff] }
 0x3fa   :  { %v515_v62 = vpop.permute.xlu1 %514 }
 0x3fd   :  { %v2455_v56 = vpop.eup %2454 }
 0x3fe   :  { %v351_v57 = vsel %vm187_vm2, %v2455_v56, 0.0 }
 0x3ff   :  { %352 = vadd.xlane.f32.xlu0 %v351_v57 }
 0x401   :  { %v2457_v58 = vpop.eup %2456 }
 0x402   :  { %v354_v59 = vsel %vm187_vm2, %v2457_v58, 0.0 }
 0x403   :  { %355 = vadd.xlane.f32.xlu1 %v354_v59 }
 0x414   :  { %592 = vrot.lane.b32.xlu1 %v2628_v39, %s2503_s24 }
 0x415   :  { %361 = vrot.lane.b32.xlu0 %v2630_v41, %s2501_s4 }
 0x418   :  { %1009 = vrot.lane.b32.xlu1 %v2630_v41, %s2504_s25 }
 0x419   :  { %594 = vrot.lane.b32.xlu0 %v2628_v39, %s2502_s23 }
 0x48c   :  { %v353_v63 = vpop.xlane.xlu0 %352 }
 0x48d   :  { %2458 = vrcp.f32 %v353_v63 }
 0x490   :  { %v356_v2 = vpop.xlane.xlu1 %355  ;;  %v362_v3 = vpop.permute.xlu0 %361 }
 0x491   :  { %2460 = vrcp.f32 %v356_v2  ;;  %2248 = vmatpush3.msra.mxu1 %v362_v3 }
 0x492   :  { %2252 = vmatprep.subr.mxu1 %v2498_v36 }
 0x494   :  { %v595_v8 = vpop.permute.xlu0 %594  ;;  %v593_v9 = vpop.permute.xlu1 %592 }
 0x497   :  { %v2459_v4 = vpop.eup %2458 }
 0x498   :  { %v359_v5 = vmul.f32 %v2459_v4, %v2455_v56  ;;  %v1010_v26 = vpop.permute.xlu1 %1009 }
 0x49a   :  { %2250 = vmatmul.mubr.msk.f32.vlgmr.msra.gmra.mrb[6].mxu1 %vm187_vm2, %v359_v5 }
 0x49b   :  { %v2461_v6 = vpop.eup %2460  ;;  %2253 = vmatpush3.msra.mxu1 %v438_v60  ;;  %2254 = vmatprep.mubr.msk.f32.mxu1 %vm2499_vm1, %v2498_v36 }
 0x49c   :  { %v360_v7 = vmul.f32 %v2461_v6, %v2457_v58  ;;  %2257 = vmatprep.subr.mxu1 %v2498_v36 }
 0x49e   :  { %2255 = vmatmul.mubr.msk.f32.vlgmr.msra.gmra.mrb[8].mxu1 %vm187_vm2, %v360_v7 }
 0x49f   :  { %2259 = vmatprep.mubr.msk.f32.mxu1 %vm2499_vm1, %v2498_v36 }
 0x4a2   :  { %2258 = vmatpush3.xpose.msk.msra.mxu1 %vm187_vm2, %v517_v61 }
 0x4a3   :  { %2262 = vmatprep.subr.mxu1 %v2498_v36 }
 0x4a5   :  { %2260 = vmatmul.mubr.msk.f32.vlgmr.msra.gmra.mrb[10].mxu1 %vm187_vm2, %v515_v62 }
 0x4a6   :  { %2263 = vmatpush3.xpose.msk.msra.mxu1 %vm187_vm2, %v595_v8  ;;  %2264 = vmatprep.mubr.msk.f32.mxu1 %vm2499_vm1, %v2498_v36  ;;  %v1337_v8 = vld [vmem:[%s2878_s5 + $0x10] sm:$0xff] }
 0x4a7   :  { %2272 = vmatprep.subr.mxu1 %v2498_v36 }
 0x4a9   :  { %2265 = vmatmul.mubr.msk.f32.vlgmr.msra.gmra.mrb[12].mxu1 %vm187_vm2, %v593_v9 }
 0x4aa   :  { %2274 = vmatprep.mubr.msk.f32.mxu1 %vm2499_vm1, %v2498_v36 }
 0x56d   :  { %v2676_v10 = vpop.f32.mrb[6].mxu1 }
 0x56e   :  { %v2251_v11 = vpop.f32.mrb[7].mxu1 }
 0x571   :  { %v2678_v12 = vpop.f32.mrb[8].mxu1 }
 0x572   :  { %v2256_v13 = vpop.f32.mrb[9].mxu1 }
 0x578   :  { %v588_v14 = vpop.f32.mrb[10].mxu1 }
 0x579   :  { %v2261_v15 = vpop.f32.mrb[11].mxu1  ;;  %v670_v25 = vsel %vm187_vm2, %v588_v14, -inf }
 0x57c   :  { %v666_v16 = vpop.f32.mrb[12].mxu1 }
 0x57d   :  { %v2266_v17 = vpop.f32.mrb[13].mxu1  ;;  %v673_v18 = vsel %vm187_vm2, %v666_v16, -inf }
 0x57e   :  { %674 = vmax.xlane.f32.xlu0 %v673_v18 }
 0x594   :  { %768 = vrot.lane.b32.xlu0 %v2628_v39, %s2505_s26 }
 0x598   :  { %1007 = vrot.lane.b32.xlu0 %v2630_v41, %s2506_s27 }
 0x59c   :  { %1085 = vrot.lane.b32.xlu0 %v2628_v39, %s2506_s27 }
 0x60b   :  { %v675_v19 = vpop.xlane.xlu0 %674 }
 0x60c   :  { %v677_v20 = vsub.f32 %v666_v16, %v675_v19 }
 0x60e   :  { %v680_v21 = vmul.f32 1.442695, %v677_v20 }
 0x60f   :  { %v769_v22 = vpop.permute.xlu0 %768 }
 0x610   :  { %2462 = vpow2.f32 %v680_v21  ;;  %2273 = vmatpush3.msra.mxu1 %v769_v22 }
 0x611   :  { %2287 = vmatprep.subr.mxu1 %v2498_v36 }
 0x613   :  { %v1008_v30 = vpop.permute.xlu0 %1007 }
 0x617   :  { %v1086_v32 = vpop.permute.xlu0 %1085 }
 0x61a   :  { %v2463_v23 = vpop.eup %2462 }
 0x61b   :  { %v685_v24 = vsel %vm187_vm2, %v2463_v23, 0.0 }
 0x61c   :  { %686 = vadd.xlane.f32.xlu1 %v685_v24 }
 0x62d   :  { %1087 = vrot.lane.b32.xlu1 %v2628_v39, %s2504_s25 }
 0x651   :  { %671 = vmax.xlane.f32.xlu1 %v670_v25 }
 0x6a9   :  { %v687_v27 = vpop.xlane.xlu1 %686 }
 0x6aa   :  { %2464 = vrcp.f32 %v687_v27 }
 0x6ad   :  { %v1088_v31 = vpop.permute.xlu1 %1087 }
 0x6b4   :  { %v2465_v28 = vpop.eup %2464 }
 0x6b5   :  { %v691_v29 = vmul.f32 %v2465_v28, %v2463_v23 }
 0x6b7   :  { %2275 = vmatmul.mubr.msk.f32.vlgmr.msra.gmra.mrb[14].mxu1 %vm187_vm2, %v691_v29 }
 0x6b8   :  { %2288 = vmatpush3.xpose.msk.msra.mxu1 %vm187_vm2, %v1010_v26  ;;  %2289 = vmatprep.mubr.msk.f32.mxu1 %vm2499_vm1, %v2498_v36 }
 0x6b9   :  { %2292 = vmatprep.subr.mxu1 %v2498_v36 }
 0x6bb   :  { %2290 = vmatmul.mubr.msk.f32.vlgmr.msra.gmra.mrb[16].mxu1 %vm187_vm2, %v1008_v30 }
 0x6bc   :  { %2293 = vmatpush3.xpose.msk.msra.mxu1 %vm187_vm2, %v1088_v31  ;;  %2294 = vmatprep.mubr.msk.f32.mxu1 %vm2499_vm1, %v2498_v36 }
 0x6bd   :  { %2302 = vmatprep.subr.mxu1 %v2498_v36 }
 0x6bf   :  { %2295 = vmatmul.mubr.msk.f32.vlgmr.msra.gmra.mrb[18].mxu1 %vm187_vm2, %v1086_v32 }
 0x6c0   :  { %2304 = vmatprep.mubr.msk.f32.mxu1 %vm2499_vm1, %v2498_v36 }
 0x6de   :  { %v672_v33 = vpop.xlane.xlu1 %671 }
 0x6df   :  { %v676_v34 = vsub.f32 %v588_v14, %v672_v33 }
 0x6e1   :  { %v678_v35 = vmul.f32 1.442695, %v676_v34 }
 0x6e3   :  { %2466 = vpow2.f32 %v678_v35 }
 0x6ed   :  { %v2467_v37 = vpop.eup %2466 }
 0x6ee   :  { %v682_v38 = vsel %vm187_vm2, %v2467_v37, 0.0 }
 0x6ef   :  { %683 = vadd.xlane.f32.xlu0 %v682_v38 }
 0x705   :  { %692 = vrot.lane.b32.xlu0 %v2630_v41, %s2505_s26 }
 0x709   :  { %1261 = vrot.lane.b32.xlu0 %v2628_v39, %s2507_s28 }
 0x70d   :  { %1423 = vrot.lane.b32.xlu0 %v2630_v41, %s2508_s0 }
 0x711   :  { %1501 = vrot.lane.b32.xlu0 %v2628_v39, %s2508_s0 }
 0x715   :  { %1421 = vrot.lane.b32.xlu0 %v2630_v41, %s2509_s29 }
 0x77c   :  { %v684_v40 = vpop.xlane.xlu0 %683 }
 0x77d   :  { %2468 = vrcp.f32 %v684_v40 }
 0x780   :  { %v693_v42 = vpop.permute.xlu0 %692 }
 0x781   :  { %2268 = vmatpush3.msra.mxu0 %v693_v42 }
 0x782   :  { %2277 = vmatprep.subr.mxu0 %v844_v54 }
 0x784   :  { %v1262_v43 = vpop.permute.xlu0 %1261 }
 0x785   :  { %2303 = vmatpush3.msra.mxu1 %v1262_v43 }
 0x786   :  { %2312 = vmatprep.subr.mxu1 %v2498_v36 }
 0x787   :  { %v2469_v44 = vpop.eup %2468 }
 0x788   :  { %v690_v45 = vmul.f32 %v2469_v44, %v2467_v37  ;;  %v1424_v11 = vpop.permute.xlu0 %1423 }
 0x78a   :  { %2270 = vmatmul.mubr.msk.f32.vlgmr.msra.gmra.mrb[0].mxu0 %vm187_vm2, %v690_v45  ;;  %v840_v46 = vpop.f32.mrb[14].mxu1 }
 0x78b   :  { %v2276_v47 = vpop.f32.mrb[15].mxu1  ;;  %2278 = vmatpush3.msra.mxu0 %v844_v54 }
 0x78c   :  { %2282 = vmatprep.subr.mxu0 %v513_v55  ;;  %v1502_v14 = vpop.permute.xlu0 %1501  ;;  %v1751_v47 = vld [vmem:[%s2878_s5 + $0x18] sm:$0xff] }
 0x78e   :  { %v1081_v48 = vpop.f32.mrb[16].mxu1 }
 0x78f   :  { %v2291_v49 = vpop.f32.mrb[17].mxu1  ;;  %v1163_v50 = vsel %vm187_vm2, %v1081_v48, -inf }
 0x790   :  { %1164 = vmax.xlane.f32.xlu1 %v1163_v50  ;;  %v1422_v16 = vpop.permute.xlu0 %1421 }
 0x792   :  { %v1159_v51 = vpop.f32.mrb[18].mxu1 }
 0x793   :  { %v2296_v52 = vpop.f32.mrb[19].mxu1  ;;  %v1166_v53 = vsel %vm187_vm2, %v1159_v51, -inf }
 0x794   :  { %1167 = vmax.xlane.f32.xlu1 %v1166_v53  ;;  %v2143_v52 = vld [vmem:[%s2879_s6] ss:$0 sm:$0xff] }
 0x81d   :  { %v1165_v56 = vpop.xlane.xlu1 %1164 }
 0x81e   :  { %v1169_v57 = vsub.f32 %v1081_v48, %v1165_v56 }
 0x820   :  { %v1171_v58 = vmul.f32 1.442695, %v1169_v57 }
 0x821   :  { %v1168_v59 = vpop.xlane.xlu1 %1167 }
 0x822   :  { %2470 = vpow2.f32 %v1171_v58  ;;  %v1170_v60 = vsub.f32 %v1159_v51, %v1168_v59 }
 0x824   :  { %v1173_v61 = vmul.f32 1.442695, %v1170_v60 }
 0x826   :  { %2472 = vpow2.f32 %v1173_v61 }
 0x82c   :  { %v2471_v62 = vpop.eup %2470 }
 0x82d   :  { %v1175_v63 = vsel %vm187_vm2, %v2471_v62, 0.0 }
 0x82e   :  { %1176 = vadd.xlane.f32.xlu1 %v1175_v63 }
 0x830   :  { %v2473_v2 = vpop.eup %2472 }
 0x831   :  { %v1178_v3 = vsel %vm187_vm2, %v2473_v2, 0.0 }
 0x832   :  { %1179 = vadd.xlane.f32.xlu1 %v1178_v3 }
 0x843   :  { %1185 = vrot.lane.b32.xlu1 %v2630_v41, %s2507_s28 }
 0x847   :  { %1499 = vrot.lane.b32.xlu1 %v2628_v39, %s2509_s29 }
 0x85d   :  { %v764_v4 = vpop.f32.mrb[0].mxu0 }
 0x85e   :  { %v2271_v5 = vpop.f32.mrb[1].mxu0  ;;  %2279 = vmatprep.mubr.msk.f32.mxu0 %vm187_vm2, %v764_v4 }
 0x85f   :  { %2280 = vmatmul.mubr.msk.f32.vlgmr.msra.gmra.mrb[2].mxu0 %vm187_vm2, %v840_v46 }
 0x860   :  { %2284 = vmatprep.mubr.msk.f32.mxu0 %vm187_vm2, %v2676_v10  ;;  %2283 = vmatpush3.msra.mxu0 %v513_v55 }
 0x861   :  { %2297 = vmatprep.subr.mxu0 %v2498_v36 }
 0x867   :  { %2285 = vmatmul.mubr.msk.f32.vlgmr.msra.gmra.mrb[2].mxu0 %vm187_vm2, %v2678_v12 }
 0x868   :  { %2299 = vmatprep.mubr.msk.f32.mxu0 %vm2499_vm1, %v2498_v36 }
 0x8bb   :  { %v1177_v6 = vpop.xlane.xlu1 %1176 }
 0x8bc   :  { %2474 = vrcp.f32 %v1177_v6  ;;  %v1890_v6 = vld [vmem:[%s2880_s9] sm:$0xff] }
 0x8bf   :  { %v1180_v7 = vpop.xlane.xlu1 %1179 }
 0x8c0   :  { %2476 = vrcp.f32 %v1180_v7  ;;  %v1891_v7 = vld [vmem:[%s2880_s9 + $0x8] sm:$0xff] }
 0x8c3   :  { %v1186_v9 = vpop.permute.xlu1 %1185 }
 0x8c4   :  { %2298 = vmatpush3.msra.mxu0 %v1186_v9  ;;  %v1892_v9 = vld [vmem:[%s2880_s9 + $0x10] sm:$0xff] }
 0x8c5   :  { %2307 = vmatprep.subr.mxu0 %v1337_v8 }
 0x8c6   :  { %v2475_v10 = vpop.eup %2474 }
 0x8c7   :  { %v1183_v13 = vmul.f32 %v2475_v10, %v2471_v62  ;;  %v1500_v21 = vpop.permute.xlu1 %1499 }
 0x8c9   :  { %2300 = vmatmul.mubr.msk.f32.vlgmr.msra.gmra.mrb[4].mxu0 %vm187_vm2, %v1183_v13 }
 0x8ca   :  { %v2477_v12 = vpop.eup %2476  ;;  %2308 = vmatpush3.msra.mxu0 %v1337_v8  ;;  %v2391_v8 = vpack.c.bf16 %v1891_v7, %v1890_v6  ;;  %v2151_v7 = vld [vmem:[%s2885_s12] ss:$0 sm:$0xff] }
 0x8cb   :  { %v1184_v15 = vmul.f32 %v2477_v12, %v2473_v2  ;;  %2317 = vmatprep.subr.mxu0 %v2498_v36 }
 0x8cd   :  { %2305 = vmatmul.mubr.msk.f32.vlgmr.msra.gmra.mrb[20].mxu1 %vm187_vm2, %v1184_v15 }
 0x8ce   :  { %2313 = vmatpush3.xpose.msk.msra.mxu1 %vm187_vm2, %v1424_v11  ;;  %2314 = vmatprep.mubr.msk.f32.mxu1 %vm2499_vm1, %v2498_v36  ;;  %v1893_v11 = vld [vmem:[%s2880_s9 + $0x18] sm:$0xff] }
 0x8cf   :  { %2322 = vmatprep.subr.mxu1 %v2498_v36  ;;  %v2395_v10 = vpack.c.bf16 %v1893_v11, %v1892_v9 }
 0x8d1   :  { %2315 = vmatmul.mubr.msk.f32.vlgmr.msra.gmra.mrb[22].mxu1 %vm187_vm2, %v1422_v16 }
 0x8d2   :  { %2324 = vmatprep.mubr.msk.f32.mxu1 %vm2499_vm1, %v2498_v36 }
 0x99c   :  { %v1257_v17 = vpop.f32.mrb[4].mxu0 }
 0x99d   :  { %v2301_v18 = vpop.f32.mrb[5].mxu0  ;;  %2309 = vmatprep.mubr.msk.f32.mxu0 %vm187_vm2, %v1257_v17 }
 0x9a0   :  { %v1333_v19 = vpop.f32.mrb[20].mxu1 }
 0x9a1   :  { %v2306_v20 = vpop.f32.mrb[21].mxu1  ;;  %2310 = vmatmul.mubr.msk.f32.vlgmr.msra.gmra.mrb[2].mxu0 %vm187_vm2, %v1333_v19  ;;  %v2144_v19 = vld [vmem:[%s2881_s7] ss:$0 sm:$0xff] }
 0x9a2   :  { %2318 = vmatpush3.xpose.msk.msra.mxu0 %vm187_vm2, %v1502_v14  ;;  %2319 = vmatprep.mubr.msk.f32.mxu0 %vm2499_vm1, %v2498_v36 }
 0x9a3   :  { %2327 = vmatprep.subr.mxu0 %v2498_v36 }
 0x9a4   :  { %v1495_v22 = vpop.f32.mrb[22].mxu1 }
 0x9a5   :  { %v2316_v23 = vpop.f32.mrb[23].mxu1  ;;  %2320 = vmatmul.mubr.msk.f32.vlgmr.msra.gmra.mrb[6].mxu0 %vm187_vm2, %v1500_v21  ;;  %v1577_v24 = vsel %vm187_vm2, %v1495_v22, -inf }
 0x9a6   :  { %1578 = vmax.xlane.f32.xlu0 %v1577_v24  ;;  %2329 = vmatprep.mubr.msk.f32.mxu0 %vm2499_vm1, %v2498_v36  ;;  %v2145_v23 = vld [vmem:[%s2882_s8] ss:$0 sm:$0xff] }
 0xa33   :  { %v1579_v25 = vpop.xlane.xlu0 %1578 }
 0xa34   :  { %v1583_v26 = vsub.f32 %v1495_v22, %v1579_v25 }
 0xa36   :  { %v1585_v27 = vmul.f32 1.442695, %v1583_v26 }
 0xa38   :  { %2478 = vpow2.f32 %v1585_v27 }
 0xa42   :  { %v2479_v28 = vpop.eup %2478 }
 0xa43   :  { %v1589_v29 = vsel %vm187_vm2, %v2479_v28, 0.0 }
 0xa44   :  { %1590 = vadd.xlane.f32.xlu0 %v1589_v29  ;;  %v1999_v29 = vld [vmem:[%s2883_s11 + $0x8] sm:$0xff] }
 0xa78   :  { %v1573_v30 = vpop.f32.mrb[6].mxu0 }
 0xa79   :  { %v2321_v31 = vpop.f32.mrb[7].mxu0  ;;  %v1580_v32 = vsel %vm187_vm2, %v1573_v30, -inf }
 0xa7a   :  { %1581 = vmax.xlane.f32.xlu1 %v1580_v32  ;;  %v2000_v31 = vld [vmem:[%s2883_s11 + $0x10] sm:$0xff]  ;;  %v2001_v32 = vld [vmem:[%s2883_s11 + $0x18] sm:$0xff] }
 0xa8b   :  { %1675 = vrot.lane.b32.xlu1 %v2628_v39, %s2510_s19 }
 0xad1   :  { %v1591_v40 = vpop.xlane.xlu0 %1590 }
 0xb07   :  { %v1582_v33 = vpop.xlane.xlu1 %1581 }
 0xb08   :  { %v1584_v34 = vsub.f32 %v1573_v30, %v1582_v33  ;;  %v2403_v33 = vpack.c.bf16 %v2001_v32, %v2000_v31 }
 0xb0a   :  { %v1587_v35 = vmul.f32 1.442695, %v1584_v34  ;;  %v2002_v34 = vld [vmem:[%s2883_s11 + $0x20] sm:$0xff] }
 0xb0b   :  { %v1676_v36 = vpop.permute.xlu1 %1675 }
 0xb0c   :  { %2480 = vpow2.f32 %v1587_v35  ;;  %2328 = vmatpush3.msra.mxu0 %v1676_v36  ;;  %v2003_v35 = vld [vmem:[%s2883_s11 + $0x28] sm:$0xff] }
 0xb0d   :  { %2482 = vrcp.f32 %v1591_v40  ;;  %2332 = vmatprep.subr.mxu0 %v1751_v47  ;;  %v2407_v36 = vpack.c.bf16 %v2003_v35, %v2002_v34 }
 0xb16   :  { %v2481_v37 = vpop.eup %2480 }
 0xb17   :  { %v1592_v38 = vsel %vm187_vm2, %v2481_v37, 0.0  ;;  %v2483_v43 = vpop.eup %2482 }
 0xb18   :  { %1593 = vadd.xlane.f32.xlu0 %v1592_v38  ;;  %v1597_v44 = vmul.f32 %v2483_v43, %v2479_v28  ;;  %v1998_v28 = vld [vmem:[%s2883_s11] sm:$0xff]  ;;  %v2005_v38 = vld [vmem:[%s2883_s11 + $0x38] sm:$0xff]  ;;  %v2007_v43 = vld [vmem:[%s2883_s11 + $0x48] sm:$0xff] }
 0xb19   :  { %v2399_v30 = vpack.c.bf16 %v1999_v29, %v1998_v28 }
 0xb2e   :  { %1599 = vrot.lane.b32.xlu0 %v2630_v41, %s2510_s19 }
 0xba5   :  { %v1594_v42 = vpop.xlane.xlu0 %1593 }
 0xba6   :  { %2484 = vrcp.f32 %v1594_v42  ;;  %v2006_v42 = vld [vmem:[%s2883_s11 + $0x40] sm:$0xff] }
 0xba9   :  { %v1600_v45 = vpop.permute.xlu0 %1599 }
 0xbaa   :  { %2323 = vmatpush3.msra.mxu1 %v1600_v45  ;;  %v2008_v45 = vld [vmem:[%s2883_s11 + $0x50] sm:$0xff] }
 0xbab   :  { %2325 = vmatmul.mubr.msk.f32.vlgmr.msra.gmra.mrb[24].mxu1 %vm187_vm2, %v1597_v44  ;;  %2392 = vmatprep.subr.bf16.mxu1 %v2391_v8  ;;  %v2415_v44 = vpack.c.bf16 %v2007_v43, %v2006_v42 }
 0xbac   :  { %2394 = vmatpush3.bf16.msra.mxu1 %v2391_v8 }
 0xbad   :  { %2396 = vmatprep.subr.bf16.mxu1 %v2395_v10 }
 0xbb0   :  { %v2485_v39 = vpop.eup %2484  ;;  %2398 = vmatpush3.bf16.msra.mxu1 %v2395_v10 }
 0xbb1   :  { %v1598_v46 = vmul.f32 %v2485_v39, %v2481_v37  ;;  %v2004_v37 = vld [vmem:[%s2883_s11 + $0x30] sm:$0xff]  ;;  %v2009_v39 = vld [vmem:[%s2883_s11 + $0x58] sm:$0xff] }
 0xbb2   :  { %v2411_v40 = vpack.c.bf16 %v2005_v38, %v2004_v37 }
 0xbb3   :  { %2330 = vmatmul.mubr.msk.f32.vlgmr.msra.gmra.mrb[8].mxu0 %vm187_vm2, %v1598_v46  ;;  %v2419_v46 = vpack.c.bf16 %v2009_v39, %v2008_v45 }
 0xbb4   :  { %2333 = vmatpush3.msra.mxu0 %v1751_v47  ;;  %v2010_v47 = vld [vmem:[%s2883_s11 + $0x60] sm:$0xff] }
 0xbb5   :  { %2400 = vmatprep.subr.bf16.mxu0 %v2399_v30 }
 0xc7e   :  { %v1671_v41 = vpop.f32.mrb[24].mxu1 }
 0xc7f   :  { %v2326_v48 = vpop.f32.mrb[25].mxu1  ;;  %2334 = vmatprep.mubr.msk.f32.mxu0 %vm187_vm2, %v1671_v41  ;;  %v2011_v41 = vld [vmem:[%s2883_s11 + $0x68] sm:$0xff] }
 0xc80   :  { %v2423_v48 = vpack.c.bf16 %v2011_v41, %v2010_v47 }
 0xc86   :  { %v1747_v49 = vpop.f32.mrb[8].mxu0 }
 0xc87   :  { %v2331_v50 = vpop.f32.mrb[9].mxu0  ;;  %2335 = vmatmul.mubr.msk.f32.vlgmr.msra.gmra.mrb[2].mxu0 %vm187_vm2, %v1747_v49  ;;  %v2012_v49 = vld [vmem:[%s2883_s11 + $0x70] sm:$0xff] }
 0xc88   :  { %2402 = vmatpush3.bf16.msra.mxu0 %v2399_v30  ;;  %v2013_v50 = vld [vmem:[%s2883_s11 + $0x78] sm:$0xff] }
 0xc89   :  { %2404 = vmatprep.subr.bf16.mxu0 %v2403_v33 }
 0xc8c   :  { %2406 = vmatpush3.bf16.msra.mxu0 %v2403_v33 }
 0xc8d   :  { %2408 = vmatprep.subr.bf16.mxu0 %v2407_v36 }
 0xc90   :  { %2410 = vmatpush3.bf16.msra.mxu0 %v2407_v36 }
 0xc91   :  { %2412 = vmatprep.subr.bf16.mxu0 %v2411_v40 }
 0xc94   :  { %2414 = vmatpush3.bf16.msra.mxu0 %v2411_v40 }
 0xc95   :  { %2416 = vmatprep.subr.bf16.mxu0 %v2415_v44 }
 0xc98   :  { %2418 = vmatpush3.bf16.msra.mxu0 %v2415_v44 }
 0xc99   :  { %2420 = vmatprep.subr.bf16.mxu0 %v2419_v46 }
 0xc9c   :  { %2422 = vmatpush3.bf16.msra.mxu0 %v2419_v46 }
 0xc9d   :  { %2424 = vmatprep.subr.bf16.mxu0 %v2423_v48 }
 0xca0   :  { %2426 = vmatpush3.bf16.msra.mxu0 %v2423_v48 }
 0xd5a   :  { %v2336_v51 = vpop.f32.mrb[2].mxu0 }
 0xd5b   :  { %v1836_v53 = vadd.f32 %v2336_v51, %v2589_v1  ;;  %v1824_v54 = vpop.f32.mrb[3].mxu0  ;;  %v2427_v51 = vpack.c.bf16 %v2013_v50, %v2012_v49 }
 0xd5c   :  { %v1835_v55 = vadd.f32 %v1824_v54, %v2584_v0 }
 0xd5d   :  { %v2777_v56 = vadd.f32 %v2143_v52, %v1836_v53  ;;  %2428 = vmatprep.subr.bf16.mxu0 %v2427_v51 }
 0xd5e   :  { %v2779_v57 = vadd.f32 %v2143_v52, %v1835_v55  ;;  %2430 = vmatpush3.bf16.msra.mxu0 %v2427_v51  ;;  %v2146_v52 = vld [vmem:[%s2884_s10] ss:$0 sm:$0xff] }
 0xd5f   :  { %v1851_v58 = vsel %vm48_vm0, %v2777_v56, 0.0 }
 0xd60   :  { %1852 = vadd.xlane.f32.xlu0 %v1851_v58  ;;  %v1848_v59 = vsel %vm48_vm0, %v2779_v57, 0.0 }
 0xd61   :  { %1849 = vadd.xlane.f32.xlu1 %v1848_v59 }
 0xded   :  { %v1853_v60 = vpop.xlane.xlu0 %1852 }
 0xdee   :  { %v1855_v61 = vmul.f32 0.03125, %v1853_v60  ;;  %v1850_v62 = vpop.xlane.xlu1 %1849 }
 0xdef   :  { %v1854_v63 = vmul.f32 0.03125, %v1850_v62 }
 0xdf0   :  { %v1857_v1 = vsub.f32 %v2777_v56, %v1855_v61 }
 0xdf1   :  { %v1856_v0 = vsub.f32 %v2779_v57, %v1854_v63 }
 0xdf2   :  { %v1859_v2 = vmul.f32 %v1857_v1, %v1857_v1 }
 0xdf3   :  { %v1858_v3 = vmul.f32 %v1856_v0, %v1856_v0 }
 0xdf4   :  { %v1863_v4 = vsel %vm48_vm0, %v1859_v2, 0.0 }
 0xdf5   :  { %1864 = vadd.xlane.f32.xlu1 %v1863_v4  ;;  %v1860_v5 = vsel %vm48_vm0, %v1858_v3, 0.0 }
 0xdf6   :  { %1861 = vadd.xlane.f32.xlu0 %v1860_v5 }
 0xe82   :  { %v1865_v13 = vpop.xlane.xlu1 %1864 }
 0xe83   :  { %v1867_v12 = vmul.f32 0.03125, %v1865_v13  ;;  %v1862_v14 = vpop.xlane.xlu0 %1861 }
 0xe84   :  { %v1866_v15 = vmul.f32 0.03125, %v1862_v14 }
 0xe85   :  { %v1869_v16 = vadd.f32 1e-05, %v1867_v12 }
 0xe86   :  { %v1868_v17 = vadd.f32 1e-05, %v1866_v15 }
 0xe87   :  { %2486 = vrsqrt.f32 %v1869_v16 }
 0xe88   :  { %2488 = vrsqrt.f32 %v1868_v17 }
 0xe91   :  { %v2487_v18 = vpop.eup %2486 }
 0xe92   :  { %v2489_v20 = vpop.eup %2488  ;;  %v1873_v21 = vmul.f32 %v2487_v18, %v1857_v1 }
 0xe93   :  { %v1872_v22 = vmul.f32 %v2489_v20, %v1856_v0 }
 0xe94   :  { %v1881_v24 = vmul.f32 %v2144_v19, %v1873_v21 }
 0xe95   :  { %v1880_v25 = vmul.f32 %v2144_v19, %v1872_v22 }
 0xe96   :  { %v1889_v27 = vadd.f32 %v2145_v23, %v1881_v24 }
 0xe97   :  { %v1888_v26 = vadd.f32 %v2145_v23, %v1880_v25 }
 0xe99   :  { %2345 = vmatprep.mubr.msk.f32.mxu1 %vm48_vm0, %v1888_v26 }
 0xe9a   :  { %2346 = vmatmul.mubr.msk.f32.vlgmr.msra.gmra.mrb[26].mxu1 %vm48_vm0, %v1889_v27 }
 0xf6d   :  { %v2347_v53 = vpop.f32.mrb[26].mxu1 }
 0xf6e   :  { %v1979_v54 = vadd.f32 %v2347_v53, %v2146_v52  ;;  %v1973_v55 = vpop.f32.mrb[27].mxu1 }
 0xf6f   :  { %v1974_v58 = vadd.f32 %v2146_v52, %v1973_v55 }
 0xf70   :  { %v2150_v59 = vmul.f32 -1.702, %v1979_v54 }
 0xf71   :  { %v2149_v60 = vmul.f32 -1.702, %v1974_v58 }
 0xf72   :  { %v1988_v61 = vmul.f32 1.442695, %v2150_v59 }
 0xf73   :  { %v1986_v62 = vmul.f32 1.442695, %v2149_v60 }
 0xf74   :  { %2490 = vpow2.f32 %v1988_v61 }
 0xf75   :  { %2492 = vpow2.f32 %v1986_v62 }
 0xf7e   :  { %v2491_v63 = vpop.eup %2490 }
 0xf7f   :  { %v2493_v1 = vpop.eup %2492  ;;  %v1991_v0 = vadd.f32 1.0, %v2491_v63 }
 0xf80   :  { %v1990_v2 = vadd.f32 1.0, %v2493_v1 }
 0xf81   :  { %2494 = vrcp.f32 %v1991_v0 }
 0xf82   :  { %2496 = vrcp.f32 %v1990_v2 }
 0xf8b   :  { %v2495_v3 = vpop.eup %2494 }
 0xf8c   :  { %v2497_v4 = vpop.eup %2496  ;;  %v1997_v6 = vmul.f32 %v2495_v3, %v1979_v54 }
 0xf8d   :  { %v1996_v5 = vmul.f32 %v2497_v4, %v1974_v58 }
 0xf8f   :  { %2380 = vmatprep.mubr.f32.mxu0 %v1996_v5 }
 0xf90   :  { %2381 = vmatmul.mubr.f32.vlgmr.msra.gmra.mrb[10].mxu0 %v1997_v6 }
0x1063   :  { %v2382_v8 = vpop.f32.mrb[10].mxu0 }
0x1064   :  { %v2093_v9 = vadd.f32 %v2382_v8, %v2151_v7  ;;  %v2087_v11 = vpop.f32.mrb[11].mxu0 }
0x1065   :  { %v2088_v10 = vadd.f32 %v2151_v7, %v2087_v11 }
0x1066   :  { %v2097_v13 = vadd.f32 %v2093_v9, %v2777_v56 }
0x1067   :  { %v2096_v12 = vadd.f32 %v2088_v10, %v2779_v57 }
0x1068   :  { %v2099_v14 = vsel %vm48_vm0, %v2097_v13, 0.0 }
0x1069   :  { %2101 = vst [vmem:[%s2886_s13 + $0x8] sm:$0xff] %v2099_v14  ;;  %v2098_v15 = vsel %vm48_vm0, %v2096_v12, 0.0 }
0x106a   :  { %2100 = vst [vmem:[%s2886_s13] sm:$0xff] %v2098_v15 }

</bundles_post_ra>
